<compile_context>
chip_gen: v7x
topology: tpu7x:2x2x1
jax: 0.10.0
libtpu: 0.0.40
codegen_flags: <defaults>
</compile_context>

<pallas_src>
import functools

import jax
import jax.numpy as jnp
import numpy as np
from jax.experimental import pallas as pl
from jax.experimental.pallas import tpu as pltpu


# ------------------------------- kernel ------------------------------------ #

def _fused_metrics_kernel(logits_ref, label_ref, pred_ref, c_ref,
                          loss_ref, acc_ref, ce_ref,
                          *, n_cls_rows, n_ce_rows):
    """One grid step over a lane tile of rows.

    logits_ref: [C,  T] f32   (classes on sublanes, rows on lanes)
    label_ref : [1,  T] i32
    pred_ref  : [1,  T] i32
    c_ref     : [Cc, T] f32   (row 0 = positive, rows 1.. = negatives)
    loss_ref/acc_ref/ce_ref: (1,1) f32 resident accumulators.
    """
    i = pl.program_id(0)
    tile = logits_ref.shape[-1]

    @pl.when(i == 0)
    def _init():
        loss_ref[...] = jnp.zeros_like(loss_ref)
        acc_ref[...] = jnp.zeros_like(acc_ref)
        ce_ref[...] = jnp.zeros_like(ce_ref)

    # Global row index of each lane in this tile (padding mask).
    col = jax.lax.broadcasted_iota(jnp.int32, (1, tile), 1) + i * tile
    valid_cls = (col < n_cls_rows).astype(jnp.float32)   # [1, T]
    valid_ce = (col < n_ce_rows).astype(jnp.float32)     # [1, T]

    # ---- softmax cross-entropy (per-row reduce = sublane reduce, axis 0) ----
    x = logits_ref[...].astype(jnp.float32)               # [C, T]
    lab = label_ref[...]                                   # [1, T]
    m = jnp.max(x, axis=0, keepdims=True)                  # [1, T]
    z = x - m
    lse = jnp.log(jnp.sum(jnp.exp(z), axis=0, keepdims=True))   # [1, T]
    row = jax.lax.broadcasted_iota(jnp.int32, x.shape, 0)  # [C, T]
    picked = jnp.sum(jnp.where(row == lab, z, 0.0), axis=0, keepdims=True)
    nll = lse - picked                                      # [1, T]  (no full logp tensor)
    loss_ref[...] += jnp.sum(nll * valid_cls, axis=1, keepdims=True)

    # ---- accuracy -----------------------------------------------------------
    eq = (pred_ref[...] == lab).astype(jnp.float32)         # [1, T]
    acc_ref[...] += jnp.sum(eq * valid_cls, axis=1, keepdims=True)

    # ---- contrastive ce_loss (logsumexp form; denom already includes pos) ---
    c = c_ref[...].astype(jnp.float32)                      # [Cc, T]
    cmax = jnp.max(c, axis=0, keepdims=True)                # [1, T]
    denom = jnp.sum(jnp.exp(c - cmax), axis=0, keepdims=True)
    log_exp = jnp.log(denom) - (c[0:1, :] - cmax)           # == -log(numer/denom)
    ce_ref[...] += jnp.sum(log_exp * valid_ce, axis=1, keepdims=True)

    @pl.when(i == pl.num_programs(0) - 1)
    def _finalize():
        inv = 1.0 / float(max(n_cls_rows, 1))               # static
        loss_ref[...] = loss_ref[...] * inv                  # mean CE
        acc_ref[...] = acc_ref[...] * inv                    # mean accuracy
        # ce loss is a sum in the reference -> no normalization.


# ----------------------------- call helpers --------------------------------- #

def _pick_tile(n_rows):
    """Lane-tile size: multiple of 128; bigger tiles amortize the ~0.35us/step
    grid overhead (esp. v6e); capped at 4096 to bound padding waste — VMEM use
    is tiny either way (<=8 sublanes per input)."""
    t = 512
    while t < 4096 and t < n_rows:
        t *= 2
    return t


def _pad_cols(x, width):
    pad = width - x.shape[-1]
    if pad == 0:
        return x
    return jnp.pad(x, ((0, 0), (0, pad)))


def _fused_metrics_call(logits2d, label1d, pred1d, c2d):
    """Single fused pallas_call. Inputs are already flattened:
       logits2d [B, C] f32, label1d/pred1d [B] i32, c2d [Bc, Cc] f32.
       Returns (ce_loss_mean, accuracy, contrastive_loss_sum) f32 scalars."""
    n_cls = int(label1d.shape[0])
    n_ce = int(c2d.shape[0])
    C = int(logits2d.shape[1])
    Cc = int(c2d.shape[1])

    tile = _pick_tile(max(n_cls, n_ce, 1))
    n_tiles = max(pl.cdiv(max(n_cls, 1), tile), pl.cdiv(max(n_ce, 1), tile))
    padded = n_tiles * tile

    # Lane-dense layout: rows ride the 128-lane axis.
    logits_t = _pad_cols(jnp.asarray(logits2d, jnp.float32).T, padded)   # [C,  P]
    label_r = _pad_cols(jnp.asarray(label1d, jnp.int32)[None, :], padded)  # [1, P]
    pred_r = _pad_cols(jnp.asarray(pred1d, jnp.int32)[None, :], padded)    # [1, P]
    c_t = _pad_cols(jnp.asarray(c2d, jnp.float32).T, padded)             # [Cc, P]

    kernel = functools.partial(_fused_metrics_kernel,
                               n_cls_rows=n_cls, n_ce_rows=n_ce)

    loss, acc, ce = pl.pallas_call(
        kernel,
        out_shape=(jax.ShapeDtypeStruct((1, 1), jnp.float32),
                   jax.ShapeDtypeStruct((1, 1), jnp.float32),
                   jax.ShapeDtypeStruct((1, 1), jnp.float32)),
        grid=(n_tiles,),
        in_specs=[
            pl.BlockSpec((C, tile), lambda i: (0, i)),
            pl.BlockSpec((1, tile), lambda i: (0, i)),
            pl.BlockSpec((1, tile), lambda i: (0, i)),
            pl.BlockSpec((Cc, tile), lambda i: (0, i)),
        ],
        out_specs=(
            pl.BlockSpec((1, 1), lambda i: (0, 0)),
            pl.BlockSpec((1, 1), lambda i: (0, 0)),
            pl.BlockSpec((1, 1), lambda i: (0, 0)),
        ),
        # The single grid axis accumulates into resident (1,1) outputs, so it
        # is a reduction axis -> "arbitrary" (parallel would race on megacore).
        compiler_params=pltpu.CompilerParams(
            dimension_semantics=("arbitrary",)),
    )(logits_t, label_r, pred_r, c_t)
    return loss[0, 0], acc[0, 0], ce[0, 0]


# ------------------------------- module ------------------------------------- #

class FewShotREModelPallas:
    """JAX/Pallas port of FewShotREModel's concrete methods."""

    def __init__(self, my_sentence_encoder=None):
        # sentence_encoder is an external module (DataParallel-wrapped in the
        # reference); kept opaque here — no parameters of this class itself.
        self.sentence_encoder = my_sentence_encoder

    def forward(self, support, query, N, K, Q):
        # TODO(synk): abstract in the source (raises NotImplementedError).
        raise NotImplementedError

    # Fused fast path: one pallas_call -> (loss, accuracy, ce_loss).
    def metrics(self, logits, label, pred, c_logits):
        C = logits.shape[-1]
        x = jnp.asarray(logits, jnp.float32).reshape(-1, C)
        lab = jnp.asarray(label, jnp.int32).reshape(-1)
        prd = jnp.asarray(pred, jnp.int32).reshape(-1)
        c = jnp.asarray(c_logits, jnp.float32)
        c = c.reshape(-1, c.shape[-1])
        return _fused_metrics_call(x, lab, prd, c)

    def loss(self, logits, label):
        C = logits.shape[-1]
        x = jnp.asarray(logits, jnp.float32).reshape(-1, C)
        lab = jnp.asarray(label, jnp.int32).reshape(-1)
        dummy_pred = jnp.zeros_like(lab)
        dummy_c = jnp.zeros((1, 1), jnp.float32)
        l, _, _ = _fused_metrics_call(x, lab, dummy_pred, dummy_c)
        return l

    def cp_loss(self, state, label):
        # TODO(synk): NTXentLoss is an external dependency not defined in the
        # source file; cannot reproduce its exact semantics here.
        raise NotImplementedError

    def ce_loss(self, logits, temperature=0.07):
        # (temperature is unused in the reference implementation as well)
        c = jnp.asarray(logits, jnp.float32)
        c = c.reshape(-1, c.shape[-1])
        dummy_logits = jnp.zeros((1, 1), jnp.float32)
        dummy_int = jnp.zeros((1,), jnp.int32)
        _, _, ce = _fused_metrics_call(dummy_logits, dummy_int, dummy_int, c)
        return ce

    def accuracy(self, pred, label):
        p = jnp.asarray(pred, jnp.int32).reshape(-1)
        l = jnp.asarray(label, jnp.int32).reshape(-1)
        dummy_logits = jnp.zeros((1, 1), jnp.float32)
        dummy_c = jnp.zeros((1, 1), jnp.float32)
        _, acc, _ = _fused_metrics_call(dummy_logits, l, p, dummy_c)
        return acc


# ------------------------------ reference ----------------------------------- #

def _ref_ce(logits, label):
    C = logits.shape[-1]
    x = logits.reshape(-1, C)
    lab = label.reshape(-1)
    logp = jax.nn.log_softmax(x, axis=-1)
    return -jnp.mean(logp[jnp.arange(x.shape[0]), lab])


def _ref_contrastive(logits):
    # Matches the torch reference exactly, including the +tiny term (the
    # kernel uses the equivalent logsumexp form; difference is O(tiny)).
    x = logits.reshape(-1, logits.shape[-1])
    pos, neg = x[:, 0:1], x[:, 1:]
    max_val = jnp.maximum(pos, jnp.max(neg, axis=1, keepdims=True))
    numer = jnp.exp(pos - max_val)[:, 0]
    denom = jnp.sum(jnp.exp(neg - max_val), axis=1) + numer
    tiny = jnp.finfo(jnp.float32).tiny
    return jnp.sum(-jnp.log(numer / denom + tiny))


def _ref_accuracy(pred, label):
    return jnp.mean((pred.reshape(-1) == label.reshape(-1)).astype(jnp.float32))


# --------------------------------- main -------------------------------------- #

if __name__ == "__main__":
    key = jax.random.PRNGKey(0)
    k1, k2, k3 = jax.random.split(key, 3)

    # Few-shot setup: N=4 classes, Q=3 queries per class, 2 tasks in a batch.
    N, Q, tasks = 4, 3, 2
    logits = jax.random.normal(k1, (tasks, N * Q, N), dtype=jnp.float32)
    label = jax.random.randint(k2, (tasks, N * Q), 0, N, dtype=jnp.int32)
    pred = jnp.argmax(logits, axis=-1).astype(jnp.int32)

    # Contrastive logits: [rows, 1 positive + 4 negatives]
    c_logits = jax.random.normal(k3, (tasks * N * Q, 5), dtype=jnp.float32)

    model = FewShotREModelPallas()

    # Fused path: all three metrics from a single pallas_call.
    loss_f, acc_f, ce_f = model.metrics(logits, label, pred, c_logits)
    jax.block_until_ready((loss_f, acc_f, ce_f))

    # Individual API-compatible paths.
    loss_val = jax.block_until_ready(model.loss(logits, label))
    ce_val = jax.block_until_ready(model.ce_loss(c_logits))
    acc_val = jax.block_until_ready(model.accuracy(pred, label))

    ref_loss = np.asarray(_ref_ce(logits, label))
    ref_ce = np.asarray(_ref_contrastive(c_logits))
    ref_acc = np.asarray(_ref_accuracy(pred, label))

    np.testing.assert_allclose(np.asarray(loss_f), ref_loss, rtol=1e-5, atol=1e-5)
    np.testing.assert_allclose(np.asarray(ce_f), ref_ce, rtol=1e-5, atol=1e-5)
    np.testing.assert_allclose(np.asarray(acc_f), ref_acc, rtol=1e-6, atol=1e-6)

    np.testing.assert_allclose(np.asarray(loss_val), ref_loss, rtol=1e-5, atol=1e-5)
    np.testing.assert_allclose(np.asarray(ce_val), ref_ce, rtol=1e-5, atol=1e-5)
    np.testing.assert_allclose(np.asarray(acc_val), ref_acc, rtol=1e-6, atol=1e-6)

    print("KERNEL_OK")
</pallas_src>

<mosaic_0001>
module attributes {stable_mosaic.version = 11 : i64} {
  func.func @_fused_metrics_kernel(%arg0: i32, %arg1: memref<4x512xf32, #tpu.memory_space<vmem>>, %arg2: memref<1x512xi32, #tpu.memory_space<vmem>>, %arg3: memref<1x512xi32, #tpu.memory_space<vmem>>, %arg4: memref<5x512xf32, #tpu.memory_space<vmem>>, %arg5: memref<1x1xf32, #tpu.memory_space<vmem>>, %arg6: memref<1x1xf32, #tpu.memory_space<vmem>>, %arg7: memref<1x1xf32, #tpu.memory_space<vmem>>) attributes {dimension_semantics = [#tpu.dimension_semantics<arbitrary>], iteration_bounds = array<i64: 1>, scalar_prefetch = 0 : i64, scratch_operands = 0 : i64, tpu.core_type = #tpu.core_type<tc>, window_params = [{transform_indices = @transform_0, window_bounds = array<i64: 4, 512>}, {transform_indices = @transform_1, window_bounds = array<i64: 1, 512>}, {transform_indices = @transform_2, window_bounds = array<i64: 1, 512>}, {transform_indices = @transform_3, window_bounds = array<i64: 5, 512>}, {pipeline_mode = #tpu.pipeline_mode<synchronous>, transform_indices = @transform_4, window_bounds = array<i64: 1, 1>}, {pipeline_mode = #tpu.pipeline_mode<synchronous>, transform_indices = @transform_5, window_bounds = array<i64: 1, 1>}, {pipeline_mode = #tpu.pipeline_mode<synchronous>, transform_indices = @transform_6, window_bounds = array<i64: 1, 1>}]} {
    %c0_i32 = arith.constant 0 : i32
    %0 = arith.cmpi eq, %arg0, %c0_i32 : i32
    %1 = arith.extui %0 : i1 to i32
    %c0_i32_0 = arith.constant 0 : i32
    %2 = arith.cmpi ne, %1, %c0_i32_0 : i32
    scf.if %2 {
      %cst_31 = arith.constant 0.000000e+00 : f32
      %70 = vector.broadcast %cst_31 : f32 to vector<1x1xf32>
      %c0_32 = arith.constant 0 : index
      %c0_33 = arith.constant 0 : index
      %71 = vector.load %arg5[%c0_32, %c0_33] : memref<1x1xf32, #tpu.memory_space<vmem>>, vector<1x1xf32>
      tpu.vector_store %arg5[%c0_32, %c0_33], %70 {strides = array<i32>} : memref<1x1xf32, #tpu.memory_space<vmem>>, vector<1x1xf32>,
      %cst_34 = arith.constant 0.000000e+00 : f32
      %72 = vector.broadcast %cst_34 : f32 to vector<1x1xf32>
      %c0_35 = arith.constant 0 : index
      %c0_36 = arith.constant 0 : index
      %73 = vector.load %arg6[%c0_35, %c0_36] : memref<1x1xf32, #tpu.memory_space<vmem>>, vector<1x1xf32>
      tpu.vector_store %arg6[%c0_35, %c0_36], %72 {strides = array<i32>} : memref<1x1xf32, #tpu.memory_space<vmem>>, vector<1x1xf32>,
      %cst_37 = arith.constant 0.000000e+00 : f32
      %74 = vector.broadcast %cst_37 : f32 to vector<1x1xf32>
      %c0_38 = arith.constant 0 : index
      %c0_39 = arith.constant 0 : index
      %75 = vector.load %arg7[%c0_38, %c0_39] : memref<1x1xf32, #tpu.memory_space<vmem>>, vector<1x1xf32>
      tpu.vector_store %arg7[%c0_38, %c0_39], %74 {strides = array<i32>} : memref<1x1xf32, #tpu.memory_space<vmem>>, vector<1x1xf32>,
    } else {
    }
    %3 = tpu.iota {dimensions = array<i32: 1>} : vector<1x512xi32>
    %c512_i32 = arith.constant 512 : i32
    %4 = arith.muli %arg0, %c512_i32 : i32
    %5 = vector.broadcast %4 : i32 to vector<1x512xi32>
    %6 = arith.addi %3, %5 : vector<1x512xi32>
    %c24_i32 = arith.constant 24 : i32
    %7 = vector.broadcast %c24_i32 : i32 to vector<1x512xi32>
    %8 = arith.cmpi slt, %6, %7 : vector<1x512xi32>
    %9 = arith.extui %8 : vector<1x512xi1> to vector<1x512xi32>
    %10 = arith.sitofp %9 : vector<1x512xi32> to vector<1x512xf32>
    %c24_i32_1 = arith.constant 24 : i32
    %11 = vector.broadcast %c24_i32_1 : i32 to vector<1x512xi32>
    %12 = arith.cmpi slt, %6, %11 : vector<1x512xi32>
    %13 = arith.extui %12 : vector<1x512xi1> to vector<1x512xi32>
    %14 = arith.sitofp %13 : vector<1x512xi32> to vector<1x512xf32>
    %c0 = arith.constant 0 : index
    %c0_2 = arith.constant 0 : index
    %15 = vector.load %arg1[%c0, %c0_2] : memref<4x512xf32, #tpu.memory_space<vmem>>, vector<4x512xf32>
    %c0_3 = arith.constant 0 : index
    %c0_4 = arith.constant 0 : index
    %16 = vector.load %arg2[%c0_3, %c0_4] : memref<1x512xi32, #tpu.memory_space<vmem>>, vector<1x512xi32>
    %cst = arith.constant dense<0xFF800000> : vector<512xf32>
    %17 = vector.multi_reduction <maximumf>, %15, %cst [0] : vector<4x512xf32> to vector<512xf32>
    %18 = vector.shape_cast %17 : vector<512xf32> to vector<1x512xf32>
    %19 = vector.broadcast %18 : vector<1x512xf32> to vector<4x512xf32>
    %20 = arith.subf %15, %19 : vector<4x512xf32>
    %21 = math.exp %20 : vector<4x512xf32>
    %cst_5 = arith.constant dense<0.000000e+00> : vector<512xf32>
    %22 = vector.multi_reduction <add>, %21, %cst_5 [0] : vector<4x512xf32> to vector<512xf32>
    %23 = vector.shape_cast %22 : vector<512xf32> to vector<1x512xf32>
    %24 = math.log %23 : vector<1x512xf32>
    %25 = tpu.iota {dimensions = array<i32: 0>} : vector<4x512xi32>
    %26 = vector.broadcast %16 : vector<1x512xi32> to vector<4x512xi32>
    %27 = arith.cmpi eq, %25, %26 : vector<4x512xi32>
    %cst_6 = arith.constant 0.000000e+00 : f32
    %28 = vector.broadcast %cst_6 : f32 to vector<4x512xf32>
    %29 = arith.select %27, %20, %28 : vector<4x512xi1>, vector<4x512xf32>
    %cst_7 = arith.constant dense<0.000000e+00> : vector<512xf32>
    %30 = vector.multi_reduction <add>, %29, %cst_7 [0] : vector<4x512xf32> to vector<512xf32>
    %31 = vector.shape_cast %30 : vector<512xf32> to vector<1x512xf32>
    %32 = arith.subf %24, %31 : vector<1x512xf32>
    %c0_8 = arith.constant 0 : index
    %c0_9 = arith.constant 0 : index
    %33 = vector.load %arg5[%c0_8, %c0_9] : memref<1x1xf32, #tpu.memory_space<vmem>>, vector<1x1xf32>
    %34 = arith.mulf %32, %10 : vector<1x512xf32>
    %cst_10 = arith.constant dense<0.000000e+00> : vector<1xf32>
    %35 = vector.multi_reduction <add>, %34, %cst_10 [1] : vector<1x512xf32> to vector<1xf32>
    %36 = vector.shape_cast %35 : vector<1xf32> to vector<1x1xf32>
    %37 = arith.addf %33, %36 : vector<1x1xf32>
    %c0_11 = arith.constant 0 : index
    %c0_12 = arith.constant 0 : index
    %38 = vector.load %arg5[%c0_11, %c0_12] : memref<1x1xf32, #tpu.memory_space<vmem>>, vector<1x1xf32>
    tpu.vector_store %arg5[%c0_11, %c0_12], %37 {strides = array<i32>} : memref<1x1xf32, #tpu.memory_space<vmem>>, vector<1x1xf32>,
    %c0_13 = arith.constant 0 : index
    %c0_14 = arith.constant 0 : index
    %39 = vector.load %arg3[%c0_13, %c0_14] : memref<1x512xi32, #tpu.memory_space<vmem>>, vector<1x512xi32>
    %40 = arith.cmpi eq, %39, %16 : vector<1x512xi32>
    %41 = arith.extui %40 : vector<1x512xi1> to vector<1x512xi32>
    %42 = arith.sitofp %41 : vector<1x512xi32> to vector<1x512xf32>
    %c0_15 = arith.constant 0 : index
    %c0_16 = arith.constant 0 : index
    %43 = vector.load %arg6[%c0_15, %c0_16] : memref<1x1xf32, #tpu.memory_space<vmem>>, vector<1x1xf32>
    %44 = arith.mulf %42, %10 : vector<1x512xf32>
    %cst_17 = arith.constant dense<0.000000e+00> : vector<1xf32>
    %45 = vector.multi_reduction <add>, %44, %cst_17 [1] : vector<1x512xf32> to vector<1xf32>
    %46 = vector.shape_cast %45 : vector<1xf32> to vector<1x1xf32>
    %47 = arith.addf %43, %46 : vector<1x1xf32>
    %c0_18 = arith.constant 0 : index
    %c0_19 = arith.constant 0 : index
    %48 = vector.load %arg6[%c0_18, %c0_19] : memref<1x1xf32, #tpu.memory_space<vmem>>, vector<1x1xf32>
    tpu.vector_store %arg6[%c0_18, %c0_19], %47 {strides = array<i32>} : memref<1x1xf32, #tpu.memory_space<vmem>>, vector<1x1xf32>,
    %c0_20 = arith.constant 0 : index
    %c0_21 = arith.constant 0 : index
    %49 = vector.load %arg4[%c0_20, %c0_21] : memref<5x512xf32, #tpu.memory_space<vmem>>, vector<5x512xf32>
    %cst_22 = arith.constant dense<0xFF800000> : vector<512xf32>
    %50 = vector.multi_reduction <maximumf>, %49, %cst_22 [0] : vector<5x512xf32> to vector<512xf32>
    %51 = vector.shape_cast %50 : vector<512xf32> to vector<1x512xf32>
    %52 = vector.broadcast %51 : vector<1x512xf32> to vector<5x512xf32>
    %53 = arith.subf %49, %52 : vector<5x512xf32>
    %54 = math.exp %53 : vector<5x512xf32>
    %cst_23 = arith.constant dense<0.000000e+00> : vector<512xf32>
    %55 = vector.multi_reduction <add>, %54, %cst_23 [0] : vector<5x512xf32> to vector<512xf32>
    %56 = vector.shape_cast %55 : vector<512xf32> to vector<1x512xf32>
    %57 = math.log %56 : vector<1x512xf32>
    %58 = vector.extract_strided_slice %49 {offsets = [0, 0], sizes = [1, 512], strides = [1, 1]} : vector<5x512xf32> to vector<1x512xf32>
    %59 = arith.subf %58, %51 : vector<1x512xf32>
    %60 = arith.subf %57, %59 : vector<1x512xf32>
    %c0_24 = arith.constant 0 : index
    %c0_25 = arith.constant 0 : index
    %61 = vector.load %arg7[%c0_24, %c0_25] : memref<1x1xf32, #tpu.memory_space<vmem>>, vector<1x1xf32>
    %62 = arith.mulf %60, %14 : vector<1x512xf32>
    %cst_26 = arith.constant dense<0.000000e+00> : vector<1xf32>
    %63 = vector.multi_reduction <add>, %62, %cst_26 [1] : vector<1x512xf32> to vector<1xf32>
    %64 = vector.shape_cast %63 : vector<1xf32> to vector<1x1xf32>
    %65 = arith.addf %61, %64 : vector<1x1xf32>
    %c0_27 = arith.constant 0 : index
    %c0_28 = arith.constant 0 : index
    %66 = vector.load %arg7[%c0_27, %c0_28] : memref<1x1xf32, #tpu.memory_space<vmem>>, vector<1x1xf32>
    tpu.vector_store %arg7[%c0_27, %c0_28], %65 {strides = array<i32>} : memref<1x1xf32, #tpu.memory_space<vmem>>, vector<1x1xf32>,
    %c0_i32_29 = arith.constant 0 : i32
    %67 = arith.cmpi eq, %arg0, %c0_i32_29 : i32
    %68 = arith.extui %67 : i1 to i32
    %c0_i32_30 = arith.constant 0 : i32
    %69 = arith.cmpi ne, %68, %c0_i32_30 : i32
    scf.if %69 {
      %c0_31 = arith.constant 0 : index
      %c0_32 = arith.constant 0 : index
      %70 = vector.load %arg5[%c0_31, %c0_32] : memref<1x1xf32, #tpu.memory_space<vmem>>, vector<1x1xf32>
      %cst_33 = arith.constant 0.0416666679 : f32
      %71 = vector.broadcast %cst_33 : f32 to vector<1x1xf32>
      %72 = arith.mulf %70, %71 : vector<1x1xf32>
      %c0_34 = arith.constant 0 : index
      %c0_35 = arith.constant 0 : index
      %73 = vector.load %arg5[%c0_34, %c0_35] : memref<1x1xf32, #tpu.memory_space<vmem>>, vector<1x1xf32>
      tpu.vector_store %arg5[%c0_34, %c0_35], %72 {strides = array<i32>} : memref<1x1xf32, #tpu.memory_space<vmem>>, vector<1x1xf32>,
      %c0_36 = arith.constant 0 : index
      %c0_37 = arith.constant 0 : index
      %74 = vector.load %arg6[%c0_36, %c0_37] : memref<1x1xf32, #tpu.memory_space<vmem>>, vector<1x1xf32>
      %cst_38 = arith.constant 0.0416666679 : f32
      %75 = vector.broadcast %cst_38 : f32 to vector<1x1xf32>
      %76 = arith.mulf %74, %75 : vector<1x1xf32>
      %c0_39 = arith.constant 0 : index
      %c0_40 = arith.constant 0 : index
      %77 = vector.load %arg6[%c0_39, %c0_40] : memref<1x1xf32, #tpu.memory_space<vmem>>, vector<1x1xf32>
      tpu.vector_store %arg6[%c0_39, %c0_40], %76 {strides = array<i32>} : memref<1x1xf32, #tpu.memory_space<vmem>>, vector<1x1xf32>,
    } else {
    }
    return
  }
  func.func @transform_0(%arg0: i32) -> (i32, i32) {
    %c0_i32 = arith.constant 0 : i32
    %c0_i32_0 = arith.constant 0 : i32
    return %c0_i32, %arg0 : i32, i32
  }
  func.func @transform_1(%arg0: i32) -> (i32, i32) {
    %c0_i32 = arith.constant 0 : i32
    %c0_i32_0 = arith.constant 0 : i32
    return %c0_i32, %arg0 : i32, i32
  }
  func.func @transform_2(%arg0: i32) -> (i32, i32) {
    %c0_i32 = arith.constant 0 : i32
    %c0_i32_0 = arith.constant 0 : i32
    return %c0_i32, %arg0 : i32, i32
  }
  func.func @transform_3(%arg0: i32) -> (i32, i32) {
    %c0_i32 = arith.constant 0 : i32
    %c0_i32_0 = arith.constant 0 : i32
    return %c0_i32, %arg0 : i32, i32
  }
  func.func @transform_4(%arg0: i32) -> (i32, i32) {
    %c0_i32 = arith.constant 0 : i32
    %c0_i32_0 = arith.constant 0 : i32
    %c0_i32_1 = arith.constant 0 : i32
    return %c0_i32, %c0_i32_0 : i32, i32
  }
  func.func @transform_5(%arg0: i32) -> (i32, i32) {
    %c0_i32 = arith.constant 0 : i32
    %c0_i32_0 = arith.constant 0 : i32
    %c0_i32_1 = arith.constant 0 : i32
    return %c0_i32, %c0_i32_0 : i32, i32
  }
  func.func @transform_6(%arg0: i32) -> (i32, i32) {
    %c0_i32 = arith.constant 0 : i32
    %c0_i32_0 = arith.constant 0 : i32
    %c0_i32_1 = arith.constant 0 : i32
    return %c0_i32, %c0_i32_0 : i32, i32
  }
}

</mosaic_0001>

<bundles_post_ra>
// kernel: tpu_custom_call.1
= control target key start
LH: loop header
LB: loop body
LE: loop exit
PB: predicated region body
PF: predicated region fallthrough
CT: control target
= control target key end

     0   :  { %12 = vsyncpa [#allocation3], 0  ;;  %s893_s0 = inlined_call_operand.hbm [shape: f32[4,512], index: 0, kind: input, shape index: {}]   ;;  %s894_s1 = inlined_call_operand.hbm [shape: s32[1,512], index: 1, kind: input, shape index: {}]   ;;  %s895_s2 = inlined_call_operand.vmem [shape: s32[1,512], index: 2, kind: input, shape index: {}]   ;;  %s896_s3 = inlined_call_operand.hbm [shape: f32[5,512], index: 3, kind: input, shape index: {}]   ;;  %s897_s4 = inlined_call_operand.hbm [shape: f32[1,1], index: 4, kind: output, shape index: {0}]   ;;  %s898_s5 = inlined_call_operand.hbm [shape: f32[1,1], index: 5, kind: output, shape index: {1}]   ;;  %s899_s6 = inlined_call_operand.hbm [shape: f32[1,1], index: 6, kind: output, shape index: {2}]  }
   0x1   :  { %13 = vsyncpa [#allocation6], 0 }
   0x2   :  { %14 = vsyncpa [#allocation4], 0 }
   0x3   :  { %15 = vsyncpa [#allocation10], 0  ;;  %s660_s21 = smov [#allocation5]   ;;  %s661_s23 = smov [#allocation2]  }
   0x4   :  { %s32_s22 = sshll.u32 %s660_s21, 4  ;;  %s22_s24 = sshll.u32 %s661_s23, 4  ;;  %s33_s22 = int_to_ptr.vmem [resolvable:$true] %s32_s22  ;;  %s23_s24 = int_to_ptr.vmem [resolvable:$true] %s22_s24 }
   0x5   :  { %s520_s27 = scalar_lea.hbm %s894_s1, 64 }
   0x6   :  { %p521_p0 = scmp.ne.s32.totalorder %s894_s1, %s520_s27  ;;  %p524_p1 = scmp.lt.u32.totalorder %s520_s27, %s894_s1 }
   0x8   :  { %p526_p2 = pnand %p524_p1, %p521_p0 }
   0xa   :  { %529 = shalt.err (!%p526_p2)
}
   0xb   :  { %s530_s8 = scalar_lea.vmem %s33_s22, 64  ;;  %p535_p4 = scmp.lt.s32.totalorder %s33_s22, %s33_s22 }
   0xc   :  { %p531_p3 = scmp.ne.s32.totalorder %s33_s22, %s530_s8  ;;  %p536_p5 = scmp.lt.s32.totalorder %s530_s8, %s530_s8 }
   0xe   :  { %p537_p6 = por %p536_p5, %p535_p4 }
  0x10   :  { %p538_p7 = pnand %p537_p6, %p531_p3 }
  0x12   :  { %541 = shalt.err (!%p538_p7)
}
  0x13   :  { %35 = dma.hbm_to_vmem [thread:$0]  %s894_s1, 64, %s33_s22, [#allocation6]  }
  0x14   :  { %s542_s13 = scalar_lea.hbm %s893_s0, 256 }
  0x15   :  { %p543_p8 = scmp.ne.s32.totalorder %s893_s0, %s542_s13  ;;  %p546_p9 = scmp.lt.u32.totalorder %s542_s13, %s893_s0 }
  0x17   :  { %p548_p10 = pnand %p546_p9, %p543_p8 }
  0x19   :  { %551 = shalt.err (!%p548_p10)
}
  0x1a   :  { %s552_s18 = scalar_lea.vmem %s23_s24, 256  ;;  %p557_p12 = scmp.lt.s32.totalorder %s23_s24, %s23_s24 }
  0x1b   :  { %p553_p11 = scmp.ne.s32.totalorder %s23_s24, %s552_s18  ;;  %p558_p13 = scmp.lt.s32.totalorder %s552_s18, %s552_s18 }
  0x1d   :  { %p559_p0 = por %p558_p13, %p557_p12 }
  0x1f   :  { %p560_p1 = pnand %p559_p0, %p553_p11 }
  0x21   :  { %563 = shalt.err (!%p560_p1)
}
  0x22   :  { %25 = dma.hbm_to_vmem [thread:$0]  %s893_s0, 256, %s23_s24, [#allocation3]  }
  0x23   :  { %s662_s20 = smov [#allocation7]   ;;  %s564_s25 = scalar_lea.hbm %s896_s3, 512 }
  0x24   :  { %s44_s21 = sshll.u32 %s662_s20, 4  ;;  %p565_p2 = scmp.ne.s32.totalorder %s896_s3, %s564_s25  ;;  %s45_s21 = int_to_ptr.vmem [resolvable:$true] %s44_s21 }
  0x25   :  { %p568_p3 = scmp.lt.u32.totalorder %s564_s25, %s896_s3 }
  0x27   :  { %p570_p4 = pnand %p568_p3, %p565_p2 }
  0x29   :  { %573 = shalt.err (!%p570_p4)
}
  0x2a   :  { %s574_s30 = scalar_lea.vmem %s45_s21, 512  ;;  %p579_p6 = scmp.lt.s32.totalorder %s45_s21, %s45_s21 }
  0x2b   :  { %p575_p5 = scmp.ne.s32.totalorder %s45_s21, %s574_s30  ;;  %p580_p7 = scmp.lt.s32.totalorder %s574_s30, %s574_s30 }
  0x2d   :  { %p581_p8 = por %p580_p7, %p579_p6 }
  0x2f   :  { %p582_p9 = pnand %p581_p8, %p575_p5 }
  0x31   :  { %585 = shalt.err (!%p582_p9)
}
  0x32   :  { %47 = dma.hbm_to_vmem [thread:$0]  %s896_s3, 512, %s45_s21, [#allocation6]  }
  0x33   :  { %652 = dma.done.wait [#allocation3], 256  }
  0x34   :  { %653 = vsyncadd [#allocation3], 4294967040 }
  0x35   :  { %654 = dma.done.wait [#allocation6], 576  }
  0x36   :  { %655 = vsyncadd [#allocation6], 4294966720  ;;  %v65_v0 = vlaneseq  ;;  %v663_v1 = vmov 1966171168   ;;  %vm61_vm0 = vcmask 0   ;;  %v664_v5 = vmov 0.0  }
  0x37   :  { %v271_v2 = vunpack.c.l.s4 %v663_v1  ;;  %v269_v6 = vcombine.low %v664_v5, %v664_v5  ;;  %63 = vst.msk [vmem:[#allocation9] sm:$0x1] %vm61_vm0, %v664_v5  ;;  %62 = vst.msk [vmem:[#allocation8] sm:$0x1] %vm61_vm0, %v664_v5  ;;  %vm97_vm2 = vcmask 1043456   ;;  %v753_v14 = vld [vmem:[#allocation2] sm:$0xff] }
  0x38   :  { %v66_v3 = vand.u32 127, %v65_v0  ;;  %v739_v4 = vshrl.u32 %v65_v0, 7  ;;  %64 = vst.msk [vmem:[#allocation11] sm:$0x1] %vm61_vm0, %v664_v5  ;;  %v748_v11 = vld [vmem:[#allocation5] sm:$0xf]  ;;  %v93_v17 = vcombine.high %v753_v14, %v753_v14 }
  0x39   :  { %v272_v7 = vunpack.c.0.s8 %v271_v2  ;;  %v259_v12 = vld [vmem:[%s895_s2] sm:$0xf]  ;;  %v756_v16 = vld [vmem:[#allocation2 + $0x8] sm:$0xff]  ;;  %v98_v18 = vsel %vm97_vm2, %v753_v14, -inf  ;;  %vm315_vm4 = vcmask 1040384   ;;  %vm331_vm5 = vcmask 1044480  }
  0x3a   :  { %vm76_vm1 = vcmp.lt.s32.totalorder %v66_v3, 24  ;;  %vm260_vm3 = vcmp.eq.s32.totalorder %v259_v12, %v748_v11  ;;  %v94_v19 = vcombine.high %v756_v16, %v756_v16  ;;  %v99_v20 = vrot.slane %v98_v18, 4  ;;  %v778_v47 = vld [vmem:[#allocation7] sm:$0x1f]  ;;  %v780_v52 = vld [vmem:[#allocation7 + $0x8] sm:$0x1f] }
  0x3b   :  { %v744_v8 = vsel %vm76_vm1, 1.0, %v664_v5  ;;  %v275_v9 = vsub.s32 %v272_v7, %v739_v4  ;;  %v112_v21 = vsel %vm97_vm2, %v756_v16, -inf  ;;  %v105_v23 = vsel %vm97_vm2, %v93_v17, -inf  ;;  %v782_v53 = vld [vmem:[#allocation7 + $0x10] sm:$0x1f]  ;;  %s665_s2 = smov [#allocation9]  }
  0x3c   :  { %v268_v10 = vcombine.low %v744_v8, %v664_v5  ;;  %v113_v24 = vrot.slane %v112_v21, 4  ;;  %v481_v25 = vsel %vm260_vm3, 1.0, %v664_v5  ;;  %v100_v26 = vmax.f32 %v98_v18, %v99_v20  ;;  %v788_v63 = vld [vmem:[#allocation7 + $0x18] sm:$0x1f]  ;;  %s453_s8 = sshll.u32 %s665_s2, 4  ;;  %s454_s8 = int_to_ptr.vmem [resolvable:$true] %s453_s8 }
  0x3d   :  { %v283_v13 = vrot.slane %v269_v6, %v275_v9  ;;  %v106_v27 = vrot.slane %v105_v23, 4  ;;  %v119_v28 = vsel %vm97_vm2, %v94_v19, -inf  ;;  %v186_v29 = vsub.s32 0, %v739_v4  ;;  %s586_s9 = scalar_lea.vmem %s454_s8, 16  ;;  %s590_s10 = scalar_lea.vmem %s454_s8, 32 }
  0x3e   :  { %v276_v15 = vrot.slane %v268_v10, %v275_v9  ;;  %v114_v31 = vmax.f32 %v112_v21, %v113_v24  ;;  %v120_v32 = vrot.slane %v119_v28, 4  ;;  %v190_v33 = vsub.s32 1, %v739_v4  ;;  %p587_p10 = scmp.ne.s32.totalorder %s454_s8, %s586_s9  ;;  %p591_p11 = scmp.lt.s32.totalorder %s454_s8, %s454_s8 }
  0x3f   :  { %v194_v34 = vsub.s32 2, %v739_v4  ;;  %v101_v35 = vrot.slane %v100_v26, 2  ;;  %v107_v36 = vmax.f32 %v105_v23, %v106_v27  ;;  %v198_v37 = vsub.s32 3, %v739_v4  ;;  %p592_p12 = scmp.lt.s32.totalorder %s590_s10, %s586_s9 }
  0x40   :  { %v284_v22 = vcombine.low %v276_v15, %v283_v13  ;;  %v115_v39 = vrot.slane %v114_v31, 2  ;;  %v121_v40 = vmax.f32 %v119_v28, %v120_v32  ;;  %v332_v0 = vsel %vm331_vm5, %v778_v47, -inf }
  0x41   :  { %v102_v41 = vmax.f32 %v100_v26, %v101_v35  ;;  %v108_v42 = vrot.slane %v107_v36, 2  ;;  %v339_v1 = vsel %vm331_vm5, %v780_v52, -inf  ;;  %v346_v2 = vsel %vm331_vm5, %v782_v53, -inf  ;;  %p593_p13 = por %p592_p12, %p591_p11 }
  0x42   :  { %v291_v30 = vrot.slane %v284_v22, %v275_v9  ;;  %v116_v50 = vmax.f32 %v114_v31, %v115_v39  ;;  %v122_v51 = vrot.slane %v121_v40, 2  ;;  %v187_v6 = vrot.slane %v748_v11, %v186_v29 }
  0x43   :  { %v103_v48 = vrot.slane %v102_v41, 1  ;;  %v109_v49 = vmax.f32 %v107_v36, %v108_v42  ;;  %v333_v7 = vrot.slane %v332_v0, 4  ;;  %v340_v12 = vrot.slane %v339_v1, 4  ;;  %p594_p0 = pnand %p593_p13, %p587_p10 }
  0x44   :  { %v293_v38 = vmul.f32 %v481_v25, %v291_v30  ;;  %v117_v61 = vrot.slane %v116_v50, 1  ;;  %v123_v62 = vmax.f32 %v121_v40, %v122_v51  ;;  %v347_v13 = vrot.slane %v346_v2, 4 }
  0x45   :  { %v104_v59 = vmax.f32 %v102_v41, %v103_v48  ;;  %v110_v60 = vrot.slane %v109_v49, 1  ;;  %v334_v18 = vmax.f32 %v332_v0, %v333_v7  ;;  %v353_v19 = vsel %vm331_vm5, %v788_v63, -inf }
  0x46   :  { %v298_v43 = vrot.slane %v293_v38, %v186_v29  ;;  %v302_v44 = vrot.slane %v293_v38, %v190_v33  ;;  %v306_v45 = vrot.slane %v293_v38, %v194_v34  ;;  %v310_v46 = vrot.slane %v293_v38, %v198_v37 }
  0x47   :  { %v111_v5 = vmax.f32 %v109_v49, %v110_v60  ;;  %v118_v9 = vmax.f32 %v116_v50, %v117_v61  ;;  %v124_v10 = vrot.slane %v123_v62, 1  ;;  %v341_v21 = vmax.f32 %v339_v1, %v340_v12 }
  0x48   :  { %v316_v54 = vsel %vm315_vm4, %v298_v43, 0.0  ;;  %v317_v55 = vsel %vm315_vm4, %v302_v44, 0.0  ;;  %v319_v56 = vsel %vm315_vm4, %v306_v45, 0.0  ;;  %v321_v57 = vsel %vm315_vm4, %v310_v46, 0.0 }
  0x49   :  { %v318_v58 = vadd.f32 %v317_v55, %v316_v54  ;;  %v130_v17 = vcombine.low %v104_v59, %v111_v5  ;;  %v125_v20 = vmax.f32 %v123_v62, %v124_v10  ;;  %v348_v22 = vmax.f32 %v346_v2, %v347_v13 }
  0x4a   :  { %v335_v24 = vrot.slane %v334_v18, 2  ;;  %v342_v26 = vrot.slane %v341_v21, 2  ;;  %v354_v28 = vrot.slane %v353_v19, 4  ;;  %vm200_vm6 = vcmp.eq.s32.totalorder %v739_v4, %v187_v6 }
  0x4b   :  { %v320_v3 = vadd.f32 %v319_v56, %v318_v58  ;;  %v134_v23 = vsub.f32 %v753_v14, %v130_v17  ;;  %v131_v25 = vcombine.low %v118_v9, %v125_v20  ;;  %v349_v27 = vrot.slane %v348_v22, 2 }
  0x4c   :  { %v336_v30 = vmax.f32 %v334_v18, %v335_v24  ;;  %v343_v32 = vmax.f32 %v341_v21, %v342_v26  ;;  %v191_v35 = vrot.slane %v748_v11, %v190_v33  ;;  %v195_v39 = vrot.slane %v748_v11, %v194_v34 }
  0x4d   :  { %v322_v15 = vadd.f32 %v321_v57, %v320_v3  ;;  %v136_v29 = vmul.f32 1.442695, %v134_v23  ;;  %v135_v31 = vsub.f32 %v756_v16, %v131_v25  ;;  %v350_v38 = vmax.f32 %v348_v22, %v349_v27 }
  0x4e   :  { %v337_v36 = vrot.slane %v336_v30, 1  ;;  %v210_v40 = vsel %vm200_vm6, %v134_v23, 0.0  ;;  %v355_v41 = vmax.f32 %v353_v19, %v354_v28  ;;  %v199_v42 = vrot.slane %v748_v11, %v198_v37 }
  0x4f   :  { %323 = vadd.xlane.f32.xlu0 %v322_v15  ;;  %492 = vpow2.f32 %v136_v29  ;;  %v138_v14 = vmul.f32 1.442695, %v135_v31  ;;  %v206_v43 = vcombine.high %v134_v23, %v134_v23  ;;  %v344_v44 = vrot.slane %v343_v32, 1 }
  0x50   :  { %v338_v16 = vmax.f32 %v336_v30, %v337_v36  ;;  %vm201_vm7 = vcmp.eq.s32.totalorder %v739_v4, %v191_v35  ;;  %v214_v33 = vsel %vm97_vm2, %v210_v40, 0.0  ;;  %v351_v45 = vrot.slane %v350_v38, 1 }
  0x51   :  { %494 = vpow2.f32 %v138_v14  ;;  %vm202_vm8 = vcmp.eq.s32.totalorder %v739_v4, %v195_v39  ;;  %v345_v46 = vmax.f32 %v343_v32, %v344_v44  ;;  %v356_v48 = vrot.slane %v355_v41, 2 }
  0x52   :  { %vm203_vm9 = vcmp.eq.s32.totalorder %v739_v4, %v199_v42  ;;  %v207_v34 = vcombine.high %v135_v31, %v135_v31  ;;  %v352_v49 = vmax.f32 %v350_v38, %v351_v45  ;;  %v816_v50 = vsub.f32 %v778_v47, %v338_v16 }
  0x53   :  { %v211_v11 = vsel %vm201_vm7, %v206_v43, 0.0  ;;  %v215_v37 = vrot.slane %v214_v33, 4  ;;  %v357_v51 = vmax.f32 %v355_v41, %v356_v48  ;;  %v819_v54 = vsub.f32 %v780_v52, %v345_v46 }
  0x54   :  { %v822_v55 = vsub.f32 %v782_v53, %v352_v49  ;;  %v364_v56 = vmul.f32 1.442695, %v816_v50  ;;  %v212_v57 = vsel %vm202_vm8, %v135_v31, 0.0  ;;  %v213_v60 = vsel %vm203_vm9, %v207_v34, 0.0 }
  0x55   :  { %v358_v58 = vrot.slane %v357_v51, 1  ;;  %v366_v4 = vmul.f32 1.442695, %v819_v54  ;;  %v221_v47 = vsel %vm97_vm2, %v211_v11, 0.0  ;;  %v216_v0 = vadd.f32 %v215_v37, %v214_v33 }
  0x56   :  { %496 = vpow2.f32 %v364_v56  ;;  %v368_v61 = vmul.f32 1.442695, %v822_v55  ;;  %v228_v53 = vsel %vm97_vm2, %v212_v57, 0.0  ;;  %v222_v6 = vrot.slane %v221_v47, 4 }
  0x57   :  { %v359_v2 = vmax.f32 %v357_v51, %v358_v58  ;;  %498 = vpow2.f32 %v366_v4  ;;  %v235_v7 = vsel %vm97_vm2, %v213_v60, 0.0  ;;  %v229_v17 = vrot.slane %v228_v53, 4 }
  0x58   :  { %500 = vpow2.f32 %v368_v61  ;;  %v217_v22 = vrot.slane %v216_v0, 2  ;;  %v236_v25 = vrot.slane %v235_v7, 4  ;;  %v223_v29 = vadd.f32 %v222_v6, %v221_v47 }
  0x59   :  { %v493_v59 = vpop.eup %492  ;;  %v834_v18 = vsub.f32 %v788_v63, %v359_v2  ;;  %v230_v32 = vadd.f32 %v229_v17, %v228_v53 }
  0x5a   :  { %v142_v62 = vcombine.high %v493_v59, %v493_v59  ;;  %v146_v52 = vsel %vm97_vm2, %v493_v59, 0.0  ;;  %v218_v38 = vadd.f32 %v217_v22, %v216_v0  ;;  %v237_v40 = vadd.f32 %v236_v25, %v235_v7 }
  0x5b   :  { %v147_v1 = vrot.slane %v146_v52, 4  ;;  %v495_v3 = vpop.eup %494  ;;  %v370_v26 = vmul.f32 1.442695, %v834_v18  ;;  %v224_v44 = vrot.slane %v223_v29, 2  ;;  %v231_v34 = vrot.slane %v230_v32, 2 }
  0x5c   :  { %v153_v5 = vsel %vm97_vm2, %v142_v62, 0.0  ;;  %v143_v9 = vcombine.high %v495_v3, %v495_v3  ;;  %v160_v13 = vsel %vm97_vm2, %v495_v3, 0.0  ;;  %v238_v58 = vrot.slane %v237_v40, 2 }
  0x5d   :  { %v148_v10 = vadd.f32 %v147_v1, %v146_v52  ;;  %v154_v12 = vrot.slane %v153_v5, 4  ;;  %v161_v15 = vrot.slane %v160_v13, 4  ;;  %502 = vpow2.f32 %v370_v26 }
  0x5e   :  { %v167_v21 = vsel %vm97_vm2, %v143_v9, 0.0  ;;  %v225_v62 = vadd.f32 %v224_v44, %v223_v29  ;;  %v232_v52 = vadd.f32 %v231_v34, %v230_v32  ;;  %v219_v3 = vrot.slane %v218_v38, 1 }
  0x5f   :  { %v149_v19 = vrot.slane %v148_v10, 2  ;;  %v155_v20 = vadd.f32 %v154_v12, %v153_v5  ;;  %v162_v23 = vadd.f32 %v161_v15, %v160_v13  ;;  %v168_v24 = vrot.slane %v167_v21, 4 }
  0x60   :  { %v497_v35 = vpop.eup %496  ;;  %v239_v5 = vadd.f32 %v238_v58, %v237_v40  ;;  %v226_v12 = vrot.slane %v225_v62, 1  ;;  %v233_v15 = vrot.slane %v232_v52, 1 }
  0x61   :  { %v150_v27 = vadd.f32 %v149_v19, %v148_v10  ;;  %v156_v28 = vrot.slane %v155_v20, 2  ;;  %v163_v30 = vrot.slane %v162_v23, 2  ;;  %v169_v31 = vadd.f32 %v168_v24, %v167_v21  ;;  %v499_v42 = vpop.eup %498 }
  0x62   :  { %v372_v41 = vsel %vm331_vm5, %v497_v35, 0.0  ;;  %v501_v45 = vpop.eup %500  ;;  %v379_v49 = vsel %vm331_vm5, %v499_v42, 0.0  ;;  %v220_v21 = vadd.f32 %v219_v3, %v218_v38  ;;  %v240_v24 = vrot.slane %v239_v5, 1 }
  0x63   :  { %v151_v63 = vrot.slane %v150_v27, 1  ;;  %v157_v36 = vadd.f32 %v156_v28, %v155_v20  ;;  %v164_v14 = vadd.f32 %v163_v30, %v162_v23  ;;  %v170_v39 = vrot.slane %v169_v31, 2 }
  0x64   :  { %v373_v33 = vrot.slane %v372_v41, 4  ;;  %v380_v51 = vrot.slane %v379_v49, 4  ;;  %v386_v4 = vsel %vm331_vm5, %v501_v45, 0.0  ;;  %v227_v28 = vadd.f32 %v226_v12, %v225_v62 }
  0x65   :  { %v152_v16 = vadd.f32 %v151_v63, %v150_v27  ;;  %v158_v43 = vrot.slane %v157_v36, 1  ;;  %v165_v46 = vrot.slane %v164_v14, 1  ;;  %v171_v48 = vadd.f32 %v170_v39, %v169_v31 }
  0x66   :  { %v374_v37 = vadd.f32 %v373_v33, %v372_v41  ;;  %v381_v60 = vadd.f32 %v380_v51, %v379_v49  ;;  %v387_v47 = vrot.slane %v386_v4, 4  ;;  %v234_v31 = vadd.f32 %v233_v15, %v232_v52 }
  0x67   :  { %v159_v11 = vadd.f32 %v158_v43, %v157_v36  ;;  %504 = vlog2.f32 %v152_v16  ;;  %v166_v56 = vadd.f32 %v165_v46, %v164_v14  ;;  %v172_v57 = vrot.slane %v171_v48, 1  ;;  %v503_v2 = vpop.eup %502 }
  0x68   :  { %v375_v59 = vrot.slane %v374_v37, 2  ;;  %v382_v1 = vrot.slane %v381_v60, 2  ;;  %v388_v53 = vadd.f32 %v387_v47, %v386_v4  ;;  %v393_v10 = vsel %vm331_vm5, %v503_v2, 0.0 }
  0x69   :  { %506 = vlog2.f32 %v159_v11  ;;  %v173_v61 = vadd.f32 %v172_v57, %v171_v48  ;;  %v394_v13 = vrot.slane %v393_v10, 4  ;;  %v241_v40 = vadd.f32 %v240_v24, %v239_v5 }
  0x6a   :  { %508 = vlog2.f32 %v166_v56  ;;  %v376_v0 = vadd.f32 %v375_v59, %v374_v37  ;;  %v383_v7 = vadd.f32 %v382_v1, %v381_v60  ;;  %v389_v9 = vrot.slane %v388_v53, 2 }
  0x6b   :  { %510 = vlog2.f32 %v173_v61  ;;  %v395_v22 = vadd.f32 %v394_v13, %v393_v10 }
  0x6c   :  { %v377_v6 = vrot.slane %v376_v0, 1  ;;  %v384_v19 = vrot.slane %v383_v7, 1  ;;  %v390_v20 = vadd.f32 %v389_v9, %v388_v53 }
  0x6d   :  { %v396_v29 = vrot.slane %v395_v22, 2 }
  0x6e   :  { %v378_v17 = vadd.f32 %v377_v6, %v376_v0  ;;  %v385_v25 = vadd.f32 %v384_v19, %v383_v7  ;;  %v391_v26 = vrot.slane %v390_v20, 1 }
  0x6f   :  { %v397_v14 = vadd.f32 %v396_v29, %v395_v22 }
  0x70   :  { %512 = vlog2.f32 %v378_v17  ;;  %v392_v32 = vadd.f32 %v391_v26, %v390_v20 }
  0x71   :  { %v505_v23 = vpop.eup %504  ;;  %514 = vlog2.f32 %v385_v25  ;;  %v398_v16 = vrot.slane %v397_v14, 1 }
  0x72   :  { %v175_v27 = vmul.f32 0.6931472, %v505_v23  ;;  %516 = vlog2.f32 %v392_v32 }
  0x73   :  { %v507_v30 = vpop.eup %506  ;;  %v399_v45 = vadd.f32 %v398_v16, %v397_v14 }
  0x74   :  { %v509_v35 = vpop.eup %508  ;;  %v177_v63 = vmul.f32 0.6931472, %v507_v30  ;;  %v242_v36 = vsub.f32 %v175_v27, %v220_v21 }
  0x75   :  { %v179_v39 = vmul.f32 0.6931472, %v509_v35  ;;  %v511_v38 = vpop.eup %510  ;;  %518 = vlog2.f32 %v399_v45 }
  0x76   :  { %v243_v41 = vsub.f32 %v177_v63, %v227_v28  ;;  %v247_v42 = vmul.f32 %v744_v8, %v242_v36  ;;  %v181_v43 = vmul.f32 0.6931472, %v511_v38 }
  0x77   :  { %v244_v44 = vsub.f32 %v179_v39, %v234_v31 }
  0x78   :  { %v248_v33 = vmul.f32 0.0, %v243_v41  ;;  %v245_v46 = vsub.f32 %v181_v43, %v241_v40 }
  0x79   :  { %v249_v48 = vmul.f32 0.0, %v244_v44 }
  0x7a   :  { %v251_v34 = vadd.f32 %v248_v33, %v247_v42  ;;  %v513_v49 = vpop.eup %512  ;;  %v250_v11 = vmul.f32 0.0, %v245_v46 }
  0x7b   :  { %v401_v51 = vmul.f32 0.6931472, %v513_v49  ;;  %v515_v56 = vpop.eup %514 }
  0x7c   :  { %v252_v37 = vadd.f32 %v251_v34, %v249_v48  ;;  %v403_v58 = vmul.f32 0.6931472, %v515_v56  ;;  %v517_v59 = vpop.eup %516 }
  0x7d   :  { %v408_v4 = vsub.f32 %v401_v51, %v816_v50  ;;  %v405_v60 = vmul.f32 0.6931472, %v517_v59 }
  0x7e   :  { %v253_v57 = vadd.f32 %v252_v37, %v250_v11  ;;  %v409_v47 = vsub.f32 %v403_v58, %v819_v54 }
  0x7f   :  { %v413_v61 = vmul.f32 %v744_v8, %v408_v4  ;;  %v410_v62 = vsub.f32 %v405_v60, %v822_v55  ;;  %v519_v1 = vpop.eup %518  ;;  %v263_v55 = vld [vmem:[#allocation9] sm:$0x1] }
  0x80   :  { %254 = vadd.xlane.f32.xlu0 %v253_v57  ;;  %v414_v52 = vmul.f32 0.0, %v409_v47  ;;  %v407_v3 = vmul.f32 0.6931472, %v519_v1 }
  0x81   :  { %v417_v0 = vsel %vm315_vm4, %v413_v61, 0.0  ;;  %v415_v53 = vmul.f32 0.0, %v410_v62 }
  0x82   :  { %v418_v2 = vsel %vm315_vm4, %v414_v52, 0.0  ;;  %v411_v6 = vsub.f32 %v407_v3, %v834_v18 }
  0x83   :  { %v419_v5 = vadd.f32 %v418_v2, %v417_v0  ;;  %v420_v50 = vsel %vm315_vm4, %v415_v53, 0.0 }
  0x84   :  { %v416_v9 = vmul.f32 0.0, %v411_v6 }
  0x85   :  { %v421_v7 = vadd.f32 %v420_v50, %v419_v5 }
  0x86   :  { %v422_v54 = vsel %vm315_vm4, %v416_v9, 0.0 }
  0x87   :  { %v423_v8 = vadd.f32 %v422_v54, %v421_v7 }
  0x89   :  { %424 = vadd.xlane.f32.xlu1 %v423_v8 }
  0xdc   :  { %v324_v10 = vpop.xlane.xlu0 %323 }
  0xdd   :  { %v325_v12 = vadd.f32 %v324_v10, %v263_v55 }
  0xdf   :  { %326 = vst.msk [vmem:[#allocation9] sm:$0x1] %vm61_vm0, %v325_v12 }
  0xe6   :  { %v434_v13 = vld [vmem:[#allocation9] sm:$0x1] }
  0xe7   :  { %v435_v15 = vmul.f32 0.041666668, %v434_v13 }
  0xe9   :  { %436 = vst.msk [vmem:[#allocation9] sm:$0x1] %vm61_vm0, %v435_v15 }
  0xea   :  { %597 = shalt.err (!%p594_p0)
}
  0xeb   :  { %s598_s13 = scalar_lea.hbm %s898_s5, 16 }
  0xec   :  { %p599_p1 = scmp.ne.s32.totalorder %s898_s5, %s598_s13  ;;  %p602_p2 = scmp.lt.u32.totalorder %s598_s13, %s898_s5 }
  0xee   :  { %p604_p3 = pnand %p602_p2, %p599_p1 }
  0xf0   :  { %607 = shalt.err (!%p604_p3)
}
  0xf1   :  { %456 = dma.vmem_to_hbm [thread:$0]  %s454_s8, 16, %s898_s5, [#allocation10]   ;;  %v246_v18 = vld [vmem:[#allocation8] sm:$0x1]  ;;  %v412_v22 = vld [vmem:[#allocation11] sm:$0x1] }
  0xf2   :  { %s666_s19 = smov [#allocation8]   ;;  %s667_s21 = smov [#allocation11]  }
  0xf3   :  { %s443_s20 = sshll.u32 %s666_s19, 4  ;;  %s463_s22 = sshll.u32 %s667_s21, 4  ;;  %s444_s20 = int_to_ptr.vmem [resolvable:$true] %s443_s20  ;;  %s464_s22 = int_to_ptr.vmem [resolvable:$true] %s463_s22 }
  0xf4   :  { %s608_s23 = scalar_lea.vmem %s444_s20, 16  ;;  %s612_s25 = scalar_lea.vmem %s444_s20, 32 }
  0xf5   :  { %p609_p4 = scmp.ne.s32.totalorder %s444_s20, %s608_s23  ;;  %p613_p5 = scmp.lt.s32.totalorder %s444_s20, %s444_s20 }
  0xf6   :  { %p614_p6 = scmp.lt.s32.totalorder %s612_s25, %s608_s23 }
  0xf8   :  { %p615_p7 = por %p614_p6, %p613_p5 }
  0xfa   :  { %p616_p8 = pnand %p615_p7, %p609_p4 }
 0x10d   :  { %v255_v17 = vpop.xlane.xlu0 %254 }
 0x10e   :  { %v256_v19 = vadd.f32 %v255_v17, %v246_v18 }
 0x110   :  { %258 = vst.msk [vmem:[#allocation8] sm:$0x1] %vm61_vm0, %v256_v19 }
 0x116   :  { %v425_v23 = vpop.xlane.xlu1 %424 }
 0x117   :  { %v431_v20 = vld [vmem:[#allocation8] sm:$0x1] }
 0x118   :  { %v432_v21 = vmul.f32 0.041666668, %v431_v20 }
 0x11a   :  { %433 = vst.msk [vmem:[#allocation8] sm:$0x1] %vm61_vm0, %v432_v21 }
 0x11b   :  { %619 = shalt.err (!%p616_p8)
}
 0x11c   :  { %s620_s27 = scalar_lea.hbm %s897_s4, 16 }
 0x11d   :  { %p621_p9 = scmp.ne.s32.totalorder %s897_s4, %s620_s27  ;;  %p624_p10 = scmp.lt.u32.totalorder %s620_s27, %s897_s4 }
 0x11f   :  { %p626_p11 = pnand %p624_p10, %p621_p9 }
 0x121   :  { %629 = shalt.err (!%p626_p11)
}
 0x122   :  { %446 = dma.vmem_to_hbm [thread:$0]  %s444_s20, 16, %s897_s4, [#allocation4]   ;;  %v426_v24 = vadd.f32 %v425_v23, %v412_v22 }
 0x123   :  { %s630_s7 = scalar_lea.vmem %s464_s22, 16  ;;  %s634_s2 = scalar_lea.vmem %s464_s22, 32 }
 0x124   :  { %427 = vst.msk [vmem:[#allocation11] sm:$0x1] %vm61_vm0, %v426_v24  ;;  %p631_p12 = scmp.ne.s32.totalorder %s464_s22, %s630_s7  ;;  %p635_p13 = scmp.lt.s32.totalorder %s464_s22, %s464_s22 }
 0x125   :  { %p636_p0 = scmp.lt.s32.totalorder %s634_s2, %s630_s7 }
 0x127   :  { %p637_p1 = por %p636_p0, %p635_p13 }
 0x129   :  { %p638_p2 = pnand %p637_p1, %p631_p12 }
 0x12b   :  { %641 = shalt.err (!%p638_p2)
}
 0x12c   :  { %s642_s10 = scalar_lea.hbm %s899_s6, 16 }
 0x12d   :  { %p643_p3 = scmp.ne.s32.totalorder %s899_s6, %s642_s10  ;;  %p646_p4 = scmp.lt.u32.totalorder %s642_s10, %s899_s6 }
 0x12f   :  { %p648_p5 = pnand %p646_p4, %p643_p3 }
 0x131   :  { %651 = shalt.err (!%p648_p5)
}
 0x132   :  { %466 = dma.vmem_to_hbm [thread:$0]  %s464_s22, 16, %s899_s6, [#allocation10]  }
 0x133   :  { %656 = dma.done.wait [#allocation4], 16  }
 0x134   :  { %657 = vsyncadd [#allocation4], 4294967280 }
 0x135   :  { %658 = dma.done.wait [#allocation10], 32  }
 0x136   :  { %659 = vsyncadd [#allocation10], 4294967264 }
 0x137   :  { %476 = vsyncpa [#allocation3], 1 }
 0x138   :  { %477 = vsyncpa [#allocation6], 1 }
 0x139   :  { %478 = vsyncpa [#allocation4], 1 }
 0x13a   :  { %479 = vsyncpa [#allocation10], 1 }

</bundles_post_ra>
